<compile_context>
chip_gen: v6e
topology: v6e:2x2x1
jax: 0.10.0
libtpu: 0.0.40
codegen_flags: <defaults>
</compile_context>

<pallas_src>
import jax
import jax.numpy as jnp
from jax.experimental import pallas as pl
from jax.experimental.pallas import tpu as pltpu

# float32(0.8413) - float32(1.0773), exactly representable in f32: the intercept of
# the a5 branch when its value 1.0773*(x-1)+0.8413 is rewritten as slope*x + c.
_A5_INTERCEPT = -0.2359999418258667


def _linear_gelu3_kernel(x_ref, o_ref):
    """One (row_block, lanes) tile of the piecewise-linear GELU approximation."""
    x = x_ref[...].astype(jnp.float32)

    # Branch a2: exact reference form.  The module gates on the *transformed*
    # value t2 (not on x), and at/just above x == -1 it keeps a2 and a3 at the
    # same time, so a2 must be computed and summed, not folded into the chain.
    t2 = -0.0773 * (x + 3.0) - 0.004
    a2 = jnp.where((t2 < -0.004) & (t2 >= -0.1586), t2, 0.0)

    # Branches a3/a4/a5/a6 as one slope/intercept select chain.  x-space
    # membership is bit-identical to the reference:
    #   a3: x in [-1, 0)    a4: x in [0, 1)    a5: x in [1, 3)    a6: x >= 3
    ge_m1 = x >= -1.0
    ge_0 = x >= 0.0
    ge_1 = x >= 1.0
    ge_3 = x >= 3.0

    slope = jnp.where(ge_m1, 0.1587, 0.0)
    slope = jnp.where(ge_0, 0.8413, slope)
    slope = jnp.where(ge_1, 1.0773, slope)
    slope = jnp.where(ge_3, 1.0, slope)

    icept = jnp.where(ge_1, _A5_INTERCEPT, 0.0)
    icept = jnp.where(ge_3, 0.0, icept)

    o_ref[...] = (slope * x + icept + a2).astype(o_ref.dtype)


def linear_gelu3(x, *, max_block_bytes=4 * 1024 * 1024):
    """Apply linearGELU3 elementwise to `x` (any shape) via a Pallas TPU kernel."""
    orig_shape = x.shape
    flat = x.reshape(-1)
    n = flat.shape[0]
    if n == 0:
        return x

    itemsize = flat.dtype.itemsize
    # Largest lane width (multiple of 128) that divides n -> the 2-D reshape is free.
    lanes = next((c for c in (512, 256, 128) if n % c == 0), 128)
    rows = pl.cdiv(n, lanes)
    max_block_rows = max(8, (max_block_bytes // (lanes * itemsize)) // 8 * 8)

    aligned = (n % lanes == 0)
    single_block_ok = rows * lanes * itemsize <= max_block_bytes

    if aligned and (rows % 8 == 0 or single_block_ok):
        if rows % 8 != 0 or rows <= 16:
            # One block equal to the full array dims (legal for any row count).
            row_block, grid_rows = rows, 1
        else:
            # Largest row block (multiple of 8, <= ~max_block_bytes) dividing
            # `rows`, preferring an even number of grid steps so both v7x
            # TensorCores get equal work under "parallel" semantics.
            cap = min(rows // 2, max_block_rows)
            divisors = [k for k in range(8, cap + 1, 8) if rows % k == 0]
            even = [k for k in divisors if (rows // k) % 2 == 0]
            row_block = (even or divisors)[-1]
            grid_rows = rows // row_block
        rows_padded = rows
    else:
        # Ragged tail (or an awkward row count too large for one block): pad
        # once -- the only path that adds an extra HBM pass.
        row_block = min(max_block_rows, -(-rows // 8) * 8)
        grid_rows = pl.cdiv(rows, row_block)
        if grid_rows > 1 and grid_rows % 2 == 1:
            grid_rows += 1
        rows_padded = grid_rows * row_block

    pad = rows_padded * lanes - n
    if pad:
        flat = jnp.pad(flat, (0, pad))
    x2d = flat.reshape(rows_padded, lanes)

    out2d = pl.pallas_call(
        _linear_gelu3_kernel,
        out_shape=jax.ShapeDtypeStruct((rows_padded, lanes), x.dtype),
        grid_spec=pltpu.PrefetchScalarGridSpec(
            num_scalar_prefetch=0,
            grid=(grid_rows,),
            in_specs=[pl.BlockSpec((row_block, lanes), lambda r: (r, 0))],
            out_specs=pl.BlockSpec((row_block, lanes), lambda r: (r, 0)),
        ),
        compiler_params=pltpu.CompilerParams(
            dimension_semantics=("parallel",),
            vmem_limit_bytes=32 * 1024 * 1024,
        ),
    )(x2d)

    if pad:
        return out2d.reshape(-1)[:n].reshape(orig_shape)
    return out2d.reshape(orig_shape)


def reference_linear_gelu3(x):
    """Pure-JAX reference following the PyTorch forward statement-by-statement."""
    xf = x.reshape(-1).astype(jnp.float32)

    a2 = -0.0773 * (xf + 3.0) - 0.004
    a2 = jnp.where(a2 >= -0.004, 0.0, a2)
    a2 = jnp.where(a2 < -0.1586, 0.0, a2)

    a3 = jnp.where(xf < -1.0, 0.0, xf)
    a3 = jnp.where(a3 >= 0.0, 0.0, a3)
    a3 = 0.1587 * (a3 + 1.0) - 0.1587

    a4 = jnp.where(xf < 0.0, 0.0, xf)
    a4 = jnp.where(a4 >= 1.0, 0.0, a4)
    a4 = 0.8413 * a4

    a5 = 1.0773 * (xf - 1.0) + 0.8413
    a5 = jnp.where(a5 < 0.8413, 0.0, a5)
    a5 = jnp.where(a5 >= 2.9959, 0.0, a5)

    a6 = jnp.where(xf < 3.0, 0.0, xf)

    return (a2 + a3 + a4 + a5 + a6).reshape(x.shape).astype(x.dtype)


if __name__ == "__main__":
    key = jax.random.PRNGKey(0)
    k1, k2, k3 = jax.random.split(key, 3)

    # Primary small test (elementwise activation on a (B, C, H, W) feature map),
    # scaled so all five branches (|x| beyond 3) are exercised.
    x = jax.random.normal(k1, (2, 4, 16, 16), dtype=jnp.float32) * 2.0
    out = jax.block_until_ready(linear_gelu3(x))
    ref = reference_linear_gelu3(x)
    assert out.shape == x.shape and out.dtype == x.dtype
    assert jnp.allclose(out, ref, atol=1e-6, rtol=1e-6), "mismatch vs JAX reference (small)"

    # Larger input: exercises the multi-step, even 'parallel' grid (2 x 2 MiB blocks).
    x_big = jax.random.normal(k2, (8, 32, 64, 64), dtype=jnp.float32) * 3.0
    out_big = jax.block_until_ready(linear_gelu3(x_big))
    assert jnp.allclose(out_big, reference_linear_gelu3(x_big), atol=1e-6, rtol=1e-6), \
        "mismatch vs JAX reference (large)"

    # Ragged element count: exercises the (rare) pad path.
    x_odd = jax.random.normal(k3, (3, 5, 7), dtype=jnp.float32) * 2.0
    out_odd = jax.block_until_ready(linear_gelu3(x_odd))
    assert jnp.allclose(out_odd, reference_linear_gelu3(x_odd), atol=1e-6, rtol=1e-6), \
        "mismatch vs JAX reference (ragged)"

    print("KERNEL_OK")
</pallas_src>

<mosaic_0001>
module attributes {stable_mosaic.version = 11 : i64} {
  func.func @_linear_gelu3_kernel(%arg0: i32, %arg1: memref<4x512xf32, #tpu.memory_space<vmem>>, %arg2: memref<4x512xf32, #tpu.memory_space<vmem>>) attributes {dimension_semantics = [#tpu.dimension_semantics<parallel>], iteration_bounds = array<i64: 1>, scalar_prefetch = 0 : i64, scratch_operands = 0 : i64, tpu.core_type = #tpu.core_type<tc>, window_params = [{transform_indices = @transform_0, window_bounds = array<i64: 4, 512>}, {transform_indices = @transform_1, window_bounds = array<i64: 4, 512>}]} {
    %c0 = arith.constant 0 : index
    %c0_0 = arith.constant 0 : index
    %0 = vector.load %arg1[%c0, %c0_0] : memref<4x512xf32, #tpu.memory_space<vmem>>, vector<4x512xf32>
    %cst = arith.constant 3.000000e+00 : f32
    %1 = vector.broadcast %cst : f32 to vector<4x512xf32>
    %2 = arith.addf %0, %1 : vector<4x512xf32>
    %cst_1 = arith.constant -7.730000e-02 : f32
    %3 = vector.broadcast %cst_1 : f32 to vector<4x512xf32>
    %4 = arith.mulf %3, %2 : vector<4x512xf32>
    %cst_2 = arith.constant 4.000000e-03 : f32
    %5 = vector.broadcast %cst_2 : f32 to vector<4x512xf32>
    %6 = arith.subf %4, %5 : vector<4x512xf32>
    %cst_3 = arith.constant -4.000000e-03 : f32
    %7 = vector.broadcast %cst_3 : f32 to vector<4x512xf32>
    %8 = arith.cmpf olt, %6, %7 : vector<4x512xf32>
    %cst_4 = arith.constant -1.586000e-01 : f32
    %9 = vector.broadcast %cst_4 : f32 to vector<4x512xf32>
    %10 = arith.cmpf oge, %6, %9 : vector<4x512xf32>
    %11 = arith.andi %8, %10 : vector<4x512xi1>
    %cst_5 = arith.constant 0.000000e+00 : f32
    %12 = vector.broadcast %cst_5 : f32 to vector<4x512xf32>
    %13 = arith.select %11, %6, %12 : vector<4x512xi1>, vector<4x512xf32>
    %cst_6 = arith.constant -1.000000e+00 : f32
    %14 = vector.broadcast %cst_6 : f32 to vector<4x512xf32>
    %15 = arith.cmpf oge, %0, %14 : vector<4x512xf32>
    %cst_7 = arith.constant 0.000000e+00 : f32
    %16 = vector.broadcast %cst_7 : f32 to vector<4x512xf32>
    %17 = arith.cmpf oge, %0, %16 : vector<4x512xf32>
    %cst_8 = arith.constant 1.000000e+00 : f32
    %18 = vector.broadcast %cst_8 : f32 to vector<4x512xf32>
    %19 = arith.cmpf oge, %0, %18 : vector<4x512xf32>
    %cst_9 = arith.constant 3.000000e+00 : f32
    %20 = vector.broadcast %cst_9 : f32 to vector<4x512xf32>
    %21 = arith.cmpf oge, %0, %20 : vector<4x512xf32>
    %cst_10 = arith.constant 1.587000e-01 : f32
    %cst_11 = arith.constant 0.000000e+00 : f32
    %22 = vector.broadcast %cst_10 : f32 to vector<4x512xf32>
    %23 = vector.broadcast %cst_11 : f32 to vector<4x512xf32>
    %24 = arith.select %15, %22, %23 : vector<4x512xi1>, vector<4x512xf32>
    %cst_12 = arith.constant 8.413000e-01 : f32
    %25 = vector.broadcast %cst_12 : f32 to vector<4x512xf32>
    %26 = arith.select %17, %25, %24 : vector<4x512xi1>, vector<4x512xf32>
    %cst_13 = arith.constant 1.077300e+00 : f32
    %27 = vector.broadcast %cst_13 : f32 to vector<4x512xf32>
    %28 = arith.select %19, %27, %26 : vector<4x512xi1>, vector<4x512xf32>
    %cst_14 = arith.constant 1.000000e+00 : f32
    %29 = vector.broadcast %cst_14 : f32 to vector<4x512xf32>
    %30 = arith.select %21, %29, %28 : vector<4x512xi1>, vector<4x512xf32>
    %cst_15 = arith.constant -0.235999942 : f32
    %cst_16 = arith.constant 0.000000e+00 : f32
    %31 = vector.broadcast %cst_15 : f32 to vector<4x512xf32>
    %32 = vector.broadcast %cst_16 : f32 to vector<4x512xf32>
    %33 = arith.select %19, %31, %32 : vector<4x512xi1>, vector<4x512xf32>
    %cst_17 = arith.constant 0.000000e+00 : f32
    %34 = vector.broadcast %cst_17 : f32 to vector<4x512xf32>
    %35 = arith.select %21, %34, %33 : vector<4x512xi1>, vector<4x512xf32>
    %36 = arith.mulf %30, %0 : vector<4x512xf32>
    %37 = arith.addf %36, %35 : vector<4x512xf32>
    %38 = arith.addf %37, %13 : vector<4x512xf32>
    %c0_18 = arith.constant 0 : index
    %c0_19 = arith.constant 0 : index
    %39 = vector.load %arg2[%c0_18, %c0_19] : memref<4x512xf32, #tpu.memory_space<vmem>>, vector<4x512xf32>
    tpu.vector_store %arg2[%c0_18, %c0_19], %38 {strides = array<i32>} : memref<4x512xf32, #tpu.memory_space<vmem>>, vector<4x512xf32>,
    return
  }
  func.func @transform_0(%arg0: i32) -> (i32, i32) {
    %c0_i32 = arith.constant 0 : i32
    %c0_i32_0 = arith.constant 0 : i32
    return %arg0, %c0_i32 : i32, i32
  }
  func.func @transform_1(%arg0: i32) -> (i32, i32) {
    %c0_i32 = arith.constant 0 : i32
    %c0_i32_0 = arith.constant 0 : i32
    return %arg0, %c0_i32 : i32, i32
  }
}

</mosaic_0001>

<bundles_post_ra>
// kernel: tpu_custom_call.1
= control target key start
LH: loop header
LB: loop body
LE: loop exit
PB: predicated region body
PF: predicated region fallthrough
CT: control target
= control target key end

     0   :  { %6 = vsyncpa [#allocation3], 0  ;;  %s150_s0 = inlined_call_operand.hbm [shape: f32[4,512], index: 0, kind: input, shape index: {}]   ;;  %s151_s1 = inlined_call_operand.hbm [shape: f32[4,512], index: 1, kind: output, shape index: {}]  }
   0x1   :  { %7 = vsyncpa [#allocation4], 0  ;;  %s129_s6 = smov [#allocation2]  }
   0x2   :  { %s14_s7 = sshll.u32 %s129_s6, 4  ;;  %s15_s7 = int_to_ptr.vmem [resolvable:$true] %s14_s7 }
   0x3   :  { %s93_s8 = scalar_lea.vmem %s15_s7, 256  ;;  %p98_p1 = scmp.lt.s32.totalorder %s15_s7, %s15_s7 }
   0x4   :  { %p94_p0 = scmp.ne.s32.totalorder %s15_s7, %s93_s8  ;;  %p99_p2 = scmp.lt.s32.totalorder %s93_s8, %s93_s8 }
   0x6   :  { %p100_p3 = por %p99_p2, %p98_p1 }
   0x8   :  { %p101_p4 = pnand %p100_p3, %p94_p0 }
   0xa   :  { %104 = shalt.err (!%p101_p4)
}
   0xb   :  { %17 = dma.hbm_to_vmem [thread:$0]  %s150_s0, 256, %s15_s7, [#allocation3]  }
   0xc   :  { %125 = dma.done.wait [#allocation3], 256  }
   0xd   :  { %126 = vsyncadd [#allocation3], 4294967040  ;;  %v21_v0 = vld [vmem:[#allocation2] sm:$0xff]  ;;  %v22_v1 = vld [vmem:[#allocation2 + $0x8] sm:$0xff]  ;;  %v130_v3 = vmov 0.0   ;;  %s131_s0 = smov [#allocation5]  }
   0xe   :  { %v23_v2 = vadd.f32 3.0, %v21_v0  ;;  %vm37_vm0 = vcmp.ge.f32.partialorder %v21_v0, -1.0  ;;  %vm39_vm1 = vcmp.ge.f32.partialorder %v21_v0, 0.0  ;;  %vm41_vm2 = vcmp.ge.f32.partialorder %v21_v0, 1.0  ;;  %s71_s11 = sshll.u32 %s131_s0, 4  ;;  %s72_s11 = int_to_ptr.vmem [resolvable:$true] %s71_s11 }
   0xf   :  { %vm43_vm3 = vcmp.ge.f32.partialorder %v21_v0, 3.0  ;;  %v45_v4 = vsel %vm37_vm0, 0.1587, %v130_v3  ;;  %v53_v5 = vsel %vm41_vm2, -0.23599994, %v130_v3  ;;  %v24_v6 = vadd.f32 3.0, %v22_v1  ;;  %p110_p6 = scmp.lt.s32.totalorder %s72_s11, %s72_s11 }
  0x10   :  { %v25_v7 = vmul.f32 -0.0773, %v23_v2  ;;  %v47_v8 = vsel %vm39_vm1, 0.8413, %v45_v4  ;;  %v55_v9 = vsel %vm43_vm3, 0.0, %v53_v5  ;;  %vm38_vm4 = vcmp.ge.f32.partialorder %v22_v1, -1.0 }
  0x11   :  { %v49_v10 = vsel %vm41_vm2, 1.0773, %v47_v8  ;;  %v26_v11 = vmul.f32 -0.0773, %v24_v6  ;;  %vm40_vm5 = vcmp.ge.f32.partialorder %v22_v1, 0.0  ;;  %vm42_vm6 = vcmp.ge.f32.partialorder %v22_v1, 1.0 }
  0x12   :  { %v80_v12 = vadd.f32 -0.004, %v25_v7  ;;  %v51_v13 = vsel %vm43_vm3, 1.0, %v49_v10  ;;  %vm44_vm7 = vcmp.ge.f32.partialorder %v22_v1, 3.0  ;;  %v46_v14 = vsel %vm38_vm4, 0.1587, %v130_v3 }
  0x13   :  { %v57_v15 = vmul.f32 %v51_v13, %v21_v0  ;;  %v81_v16 = vadd.f32 -0.004, %v26_v11  ;;  %v48_v17 = vsel %vm40_vm5, 0.8413, %v46_v14  ;;  %v54_v18 = vsel %vm42_vm6, -0.23599994, %v130_v3 }
  0x14   :  { %vm29_vm8 = vcmp.lt.f32.partialorder %v80_v12, -0.004  ;;  %vm31_vm9 = vcmp.ge.f32.partialorder %v80_v12, -0.1586  ;;  %v50_v19 = vsel %vm42_vm6, 1.0773, %v48_v17 }
  0x15   :  { %vm33_vm10 = vmand %vm29_vm8, %vm31_vm9  ;;  %v59_v20 = vadd.f32 %v57_v15, %v55_v9  ;;  %vm30_vm11 = vcmp.lt.f32.partialorder %v81_v16, -0.004  ;;  %vm32_vm12 = vcmp.ge.f32.partialorder %v81_v16, -0.1586  ;;  %v52_v21 = vsel %vm44_vm7, 1.0, %v50_v19  ;;  %s105_s12 = scalar_lea.vmem %s72_s11, 256 }
  0x16   :  { %v35_v22 = vsel %vm33_vm10, %v80_v12, 0.0  ;;  %vm34_vm13 = vmand %vm30_vm11, %vm32_vm12  ;;  %v56_v23 = vsel %vm44_vm7, 0.0, %v54_v18  ;;  %v58_v24 = vmul.f32 %v52_v21, %v22_v1  ;;  %p106_p5 = scmp.ne.s32.totalorder %s72_s11, %s105_s12  ;;  %p111_p7 = scmp.lt.s32.totalorder %s105_s12, %s105_s12 }
  0x17   :  { %v61_v25 = vadd.f32 %v59_v20, %v35_v22  ;;  %v36_v26 = vsel %vm34_vm13, %v81_v16, 0.0 }
  0x18   :  { %v60_v27 = vadd.f32 %v58_v24, %v56_v23  ;;  %p112_p8 = por %p111_p7, %p110_p6 }
  0x19   :  { %63 = vst [vmem:[#allocation5] sm:$0xff] %v61_v25 }
  0x1a   :  { %v62_v28 = vadd.f32 %v60_v27, %v36_v26  ;;  %p113_p9 = pnand %p112_p8, %p106_p5 }
  0x1c   :  { %64 = vst [vmem:[#allocation5 + $0x8] sm:$0xff] %v62_v28 }
  0x1d   :  { %116 = shalt.err (!%p113_p9)
}
  0x1e   :  { %74 = dma.vmem_to_hbm [thread:$0]  %s72_s11, 256, %s151_s1, [#allocation4]  }
  0x1f   :  { %127 = dma.done.wait [#allocation4], 256  }
  0x20   :  { %128 = vsyncadd [#allocation4], 4294967040 }
  0x21   :  { %78 = vsyncpa [#allocation3], 1 }
  0x22   :  { %79 = vsyncpa [#allocation4], 1 }

</bundles_post_ra>
